<compile_context>
chip_gen: v7x
topology: tpu7x:2x2x1
jax: 0.10.0
libtpu: 0.0.40
codegen_flags: <defaults>
</compile_context>

<pallas_src>
import jax
import jax.numpy as jnp
from jax.experimental import pallas as pl
from jax.experimental.pallas import tpu as pltpu

OBS_DIM = 5
HIDDEN = 128
N_ACTIONS = 6     # len(Action.ALL_ACTIONS) -- synthetic choice (e.g. Overcooked 6 actions)

N_OUT_PAD = 8     # store width: n_actions padded to 8 (narrow, lane-masked store;
                  # 16x fewer HBM write bytes than a 128-wide padded output)


def _cdiv(a, b):
    return (a + b - 1) // b


def _round_up(n, m):
    return ((n + m - 1) // m) * m


def _policy_kernel(x_ref, w1_ref, b1_ref, w2_ref, b2_ref, o_ref):
    # x_ref:  (tb, obs_dim)      f32
    # w1_ref: (obs_dim, HIDDEN)  f32
    # b1_ref: (1, HIDDEN)        f32
    # w2_ref: (HIDDEN, N_OUT_PAD) f32
    # b2_ref: (1, N_OUT_PAD)     f32
    # o_ref:  (tb, N_OUT_PAD)    f32
    x = x_ref[...]                     # (tb, obs_dim)
    w1 = w1_ref[...]                   # (obs_dim, HIDDEN)

    # Layer 1 on the VPU: K=5 contraction as 5 broadcast-FMAs (the MXU would be
    # ~3% utilized at K=5; the kernel is HBM-bound anyway so this is also the
    # simplest layout-safe formulation -- no K padding needed).
    h = x[:, 0:1] * w1[0:1, :]                       # (tb, HIDDEN)
    for k in range(1, x.shape[1]):                   # static, unrolled (obs_dim=5)
        h = h + x[:, k:k + 1] * w1[k:k + 1, :]
    h = jnp.maximum(h + b1_ref[...], 0.0)            # bias + ReLU, f32

    # Layer 2 on the MXU: (tb, 128) @ (128, 8), f32 accumulation.
    logits = jnp.dot(h, w2_ref[...], preferred_element_type=jnp.float32)
    o_ref[...] = logits + b2_ref[...]


def policy_forward(x, w1, b1, w2, b2, *, block_b=2048):
    """x: (B, obs_dim) f32 -> logits (B, n_actions) f32."""
    B, obs_dim = x.shape
    hidden, n_actions = w2.shape

    # Adaptive batch tiling: few large tiles (per-grid-step overhead ~0.35us),
    # bounded padding (<16 rows per tile), and >= 2 tiles for B >= 512 so both
    # v7x TensorCores get work under the "parallel" batch axis.
    n_tiles = max(1, _cdiv(B, block_b))
    if B >= 512:
        n_tiles = max(n_tiles, 2)
    tb = _round_up(_cdiv(B, n_tiles), 16)
    b_pad = n_tiles * tb

    # Feed x directly (no full pad/cast pass); only row-pad when B is ragged.
    x_in = x.astype(jnp.float32)
    if b_pad != B:
        x_in = jnp.pad(x_in, ((0, b_pad - B), (0, 0)))

    # One-time tiny weight/bias prep (negligible traffic).
    w1p = w1.astype(jnp.float32)                                   # (obs_dim, hidden)
    b1p = b1.reshape(1, hidden).astype(jnp.float32)                # (1, hidden)
    w2p = jnp.zeros((hidden, N_OUT_PAD), jnp.float32)
    w2p = w2p.at[:, :n_actions].set(w2.astype(jnp.float32))        # (hidden, 8)
    b2p = jnp.zeros((1, N_OUT_PAD), jnp.float32)
    b2p = b2p.at[:, :n_actions].set(b2.reshape(1, n_actions).astype(jnp.float32))

    grid = (n_tiles,)

    flops = 2 * b_pad * (obs_dim * hidden + hidden * N_OUT_PAD)
    bytes_accessed = (b_pad * obs_dim * 4            # x read
                      + obs_dim * hidden * 4         # w1
                      + hidden * 4                   # b1
                      + hidden * N_OUT_PAD * 4       # w2
                      + N_OUT_PAD * 4                # b2
                      + b_pad * N_OUT_PAD * 4)       # logits write

    # TODO(synk): if a downstream consumer (softmax / argmax / categorical
    # sample) is known, fuse it here so logits never round-trip HBM at all.
    out_padded = pl.pallas_call(
        _policy_kernel,
        out_shape=jax.ShapeDtypeStruct((b_pad, N_OUT_PAD), jnp.float32),
        grid_spec=pltpu.PrefetchScalarGridSpec(
            num_scalar_prefetch=0,
            grid=grid,
            in_specs=[
                pl.BlockSpec((tb, obs_dim), lambda i: (i, 0)),        # x tile
                pl.BlockSpec((obs_dim, hidden), lambda i: (0, 0)),    # w1 (resident)
                pl.BlockSpec((1, hidden), lambda i: (0, 0)),          # b1 (resident)
                pl.BlockSpec((hidden, N_OUT_PAD), lambda i: (0, 0)),  # w2 (resident)
                pl.BlockSpec((1, N_OUT_PAD), lambda i: (0, 0)),       # b2 (resident)
            ],
            out_specs=pl.BlockSpec((tb, N_OUT_PAD), lambda i: (i, 0)),
        ),
        compiler_params=pltpu.CompilerParams(
            dimension_semantics=("parallel",),        # shard batch tiles across v7x's 2 TCs
            vmem_limit_bytes=32 * 1024 * 1024,        # safe ceiling on all generations
        ),
        cost_estimate=pl.CostEstimate(
            flops=flops, transcendentals=0, bytes_accessed=bytes_accessed),
    )(x_in, w1p, b1p, w2p, b2p)

    # Slice off batch padding and the zero-padded action columns.
    return out_padded[:B, :n_actions]


def init_params(key, obs_dim=OBS_DIM, hidden=HIDDEN, n_actions=N_ACTIONS):
    """Deterministic init mimicking nn.Linear default (uniform +/- 1/sqrt(fan_in))."""
    k1, k2, k3, k4 = jax.random.split(key, 4)
    bound1 = 1.0 / jnp.sqrt(jnp.float32(obs_dim))
    bound2 = 1.0 / jnp.sqrt(jnp.float32(hidden))
    w1 = jax.random.uniform(k1, (obs_dim, hidden), jnp.float32, -bound1, bound1)
    b1 = jax.random.uniform(k2, (1, hidden), jnp.float32, -bound1, bound1)
    w2 = jax.random.uniform(k3, (hidden, n_actions), jnp.float32, -bound2, bound2)
    b2 = jax.random.uniform(k4, (1, n_actions), jnp.float32, -bound2, bound2)
    return w1, b1, w2, b2


if __name__ == "__main__":
    key = jax.random.PRNGKey(0)
    kx, kp = jax.random.split(key)
    w1, b1, w2, b2 = init_params(kp)

    fwd = jax.jit(policy_forward, static_argnames=("block_b",))

    ok = True
    # (batch, block_b): aligned single tile, ragged single tile, multi-tile + ragged.
    for batch, blk in ((8, 2048), (13, 2048), (48, 32)):
        x = jax.random.normal(jax.random.fold_in(kx, batch), (batch, OBS_DIM),
                              jnp.float32)
        logits = fwd(x, w1, b1, w2, b2, block_b=blk)
        jax.block_until_ready(logits)

        # Pure-JAX f32 reference (kernel is f32 end-to-end).
        ref = jnp.maximum(x @ w1 + b1, 0.0) @ w2 + b2
        ok &= logits.shape == (batch, N_ACTIONS)
        ok &= bool(jnp.allclose(logits, ref, atol=1e-2, rtol=1e-2))

    assert ok
    print("KERNEL_OK")
</pallas_src>

<mosaic_0001>
module attributes {stable_mosaic.version = 11 : i64} {
  func.func @_policy_kernel(%arg0: i32, %arg1: memref<16x5xf32, #tpu.memory_space<vmem>>, %arg2: memref<5x128xf32, #tpu.memory_space<vmem>>, %arg3: memref<1x128xf32, #tpu.memory_space<vmem>>, %arg4: memref<128x8xf32, #tpu.memory_space<vmem>>, %arg5: memref<1x8xf32, #tpu.memory_space<vmem>>, %arg6: memref<16x8xf32, #tpu.memory_space<vmem>>) attributes {dimension_semantics = [#tpu.dimension_semantics<parallel>], iteration_bounds = array<i64: 1>, scalar_prefetch = 0 : i64, scratch_operands = 0 : i64, tpu.core_type = #tpu.core_type<tc>, window_params = [{transform_indices = @transform_0, window_bounds = array<i64: 16, 5>}, {pipeline_mode = #tpu.pipeline_mode<synchronous>, transform_indices = @transform_1, window_bounds = array<i64: 5, 128>}, {pipeline_mode = #tpu.pipeline_mode<synchronous>, transform_indices = @transform_2, window_bounds = array<i64: 1, 128>}, {pipeline_mode = #tpu.pipeline_mode<synchronous>, transform_indices = @transform_3, window_bounds = array<i64: 128, 8>}, {pipeline_mode = #tpu.pipeline_mode<synchronous>, transform_indices = @transform_4, window_bounds = array<i64: 1, 8>}, {transform_indices = @transform_5, window_bounds = array<i64: 16, 8>}]} {
    %c0 = arith.constant 0 : index
    %c0_0 = arith.constant 0 : index
    %0 = vector.load %arg1[%c0, %c0_0] : memref<16x5xf32, #tpu.memory_space<vmem>>, vector<16x5xf32>
    %c0_1 = arith.constant 0 : index
    %c0_2 = arith.constant 0 : index
    %1 = vector.load %arg2[%c0_1, %c0_2] : memref<5x128xf32, #tpu.memory_space<vmem>>, vector<5x128xf32>
    %2 = vector.extract_strided_slice %0 {offsets = [0, 0], sizes = [16, 1], strides = [1, 1]} : vector<16x5xf32> to vector<16x1xf32>
    %3 = vector.extract_strided_slice %1 {offsets = [0, 0], sizes = [1, 128], strides = [1, 1]} : vector<5x128xf32> to vector<1x128xf32>
    %4 = vector.broadcast %2 : vector<16x1xf32> to vector<16x128xf32>
    %5 = vector.broadcast %3 : vector<1x128xf32> to vector<16x128xf32>
    %6 = arith.mulf %4, %5 : vector<16x128xf32>
    %7 = vector.extract_strided_slice %0 {offsets = [0, 1], sizes = [16, 1], strides = [1, 1]} : vector<16x5xf32> to vector<16x1xf32>
    %8 = vector.extract_strided_slice %1 {offsets = [1, 0], sizes = [1, 128], strides = [1, 1]} : vector<5x128xf32> to vector<1x128xf32>
    %9 = vector.broadcast %7 : vector<16x1xf32> to vector<16x128xf32>
    %10 = vector.broadcast %8 : vector<1x128xf32> to vector<16x128xf32>
    %11 = arith.mulf %9, %10 : vector<16x128xf32>
    %12 = arith.addf %6, %11 : vector<16x128xf32>
    %13 = vector.extract_strided_slice %0 {offsets = [0, 2], sizes = [16, 1], strides = [1, 1]} : vector<16x5xf32> to vector<16x1xf32>
    %14 = vector.extract_strided_slice %1 {offsets = [2, 0], sizes = [1, 128], strides = [1, 1]} : vector<5x128xf32> to vector<1x128xf32>
    %15 = vector.broadcast %13 : vector<16x1xf32> to vector<16x128xf32>
    %16 = vector.broadcast %14 : vector<1x128xf32> to vector<16x128xf32>
    %17 = arith.mulf %15, %16 : vector<16x128xf32>
    %18 = arith.addf %12, %17 : vector<16x128xf32>
    %19 = vector.extract_strided_slice %0 {offsets = [0, 3], sizes = [16, 1], strides = [1, 1]} : vector<16x5xf32> to vector<16x1xf32>
    %20 = vector.extract_strided_slice %1 {offsets = [3, 0], sizes = [1, 128], strides = [1, 1]} : vector<5x128xf32> to vector<1x128xf32>
    %21 = vector.broadcast %19 : vector<16x1xf32> to vector<16x128xf32>
    %22 = vector.broadcast %20 : vector<1x128xf32> to vector<16x128xf32>
    %23 = arith.mulf %21, %22 : vector<16x128xf32>
    %24 = arith.addf %18, %23 : vector<16x128xf32>
    %25 = vector.extract_strided_slice %0 {offsets = [0, 4], sizes = [16, 1], strides = [1, 1]} : vector<16x5xf32> to vector<16x1xf32>
    %26 = vector.extract_strided_slice %1 {offsets = [4, 0], sizes = [1, 128], strides = [1, 1]} : vector<5x128xf32> to vector<1x128xf32>
    %27 = vector.broadcast %25 : vector<16x1xf32> to vector<16x128xf32>
    %28 = vector.broadcast %26 : vector<1x128xf32> to vector<16x128xf32>
    %29 = arith.mulf %27, %28 : vector<16x128xf32>
    %30 = arith.addf %24, %29 : vector<16x128xf32>
    %c0_3 = arith.constant 0 : index
    %c0_4 = arith.constant 0 : index
    %31 = vector.load %arg3[%c0_3, %c0_4] : memref<1x128xf32, #tpu.memory_space<vmem>>, vector<1x128xf32>
    %32 = vector.broadcast %31 : vector<1x128xf32> to vector<16x128xf32>
    %33 = arith.addf %30, %32 : vector<16x128xf32>
    %cst = arith.constant 0.000000e+00 : f32
    %34 = vector.broadcast %cst : f32 to vector<16x128xf32>
    %35 = arith.maximumf %33, %34 : vector<16x128xf32>
    %c0_5 = arith.constant 0 : index
    %c0_6 = arith.constant 0 : index
    %36 = vector.load %arg4[%c0_5, %c0_6] : memref<128x8xf32, #tpu.memory_space<vmem>>, vector<128x8xf32>
    %cst_7 = arith.constant dense<0.000000e+00> : vector<16x8xf32>
    %37 = tpu.matmul %35, %36, %cst_7 {dimension_numbers = #tpu.dot_dimension_numbers<[1], [0], [0], [1], [0, 0, 1, 1], [], []>} : vector<16x128xf32>, vector<128x8xf32>, vector<16x8xf32> -> vector<16x8xf32>
    %c0_8 = arith.constant 0 : index
    %c0_9 = arith.constant 0 : index
    %38 = vector.load %arg5[%c0_8, %c0_9] : memref<1x8xf32, #tpu.memory_space<vmem>>, vector<1x8xf32>
    %39 = vector.broadcast %38 : vector<1x8xf32> to vector<16x8xf32>
    %40 = arith.addf %37, %39 : vector<16x8xf32>
    %c0_10 = arith.constant 0 : index
    %c0_11 = arith.constant 0 : index
    %41 = vector.load %arg6[%c0_10, %c0_11] : memref<16x8xf32, #tpu.memory_space<vmem>>, vector<16x8xf32>
    tpu.vector_store %arg6[%c0_10, %c0_11], %40 {strides = array<i32>} : memref<16x8xf32, #tpu.memory_space<vmem>>, vector<16x8xf32>,
    return
  }
  func.func @transform_0(%arg0: i32) -> (i32, i32) {
    %c0_i32 = arith.constant 0 : i32
    %c0_i32_0 = arith.constant 0 : i32
    return %arg0, %c0_i32 : i32, i32
  }
  func.func @transform_1(%arg0: i32) -> (i32, i32) {
    %c0_i32 = arith.constant 0 : i32
    %c0_i32_0 = arith.constant 0 : i32
    %c0_i32_1 = arith.constant 0 : i32
    return %c0_i32, %c0_i32_0 : i32, i32
  }
  func.func @transform_2(%arg0: i32) -> (i32, i32) {
    %c0_i32 = arith.constant 0 : i32
    %c0_i32_0 = arith.constant 0 : i32
    %c0_i32_1 = arith.constant 0 : i32
    return %c0_i32, %c0_i32_0 : i32, i32
  }
  func.func @transform_3(%arg0: i32) -> (i32, i32) {
    %c0_i32 = arith.constant 0 : i32
    %c0_i32_0 = arith.constant 0 : i32
    %c0_i32_1 = arith.constant 0 : i32
    return %c0_i32, %c0_i32_0 : i32, i32
  }
  func.func @transform_4(%arg0: i32) -> (i32, i32) {
    %c0_i32 = arith.constant 0 : i32
    %c0_i32_0 = arith.constant 0 : i32
    %c0_i32_1 = arith.constant 0 : i32
    return %c0_i32, %c0_i32_0 : i32, i32
  }
  func.func @transform_5(%arg0: i32) -> (i32, i32) {
    %c0_i32 = arith.constant 0 : i32
    %c0_i32_0 = arith.constant 0 : i32
    return %arg0, %c0_i32 : i32, i32
  }
}

</mosaic_0001>

<bundles_post_ra>
// kernel: policy_forward.1
= control target key start
LH: loop header
LB: loop body
LE: loop exit
PB: predicated region body
PF: predicated region fallthrough
CT: control target
= control target key end

     0   :  { %v320_v0 = vmov 0   ;;  %v321_v9 = vmov 1   ;;  %v322_v13 = vmov 2   ;;  %v323_v17 = vmov 3   ;;  %s424_s0 = inlined_call_operand.vmem [shape: f32[16,5], index: 0, kind: input, shape index: {}]   ;;  %s425_s3 = inlined_call_operand.vmem [shape: f32[128,8], index: 3, kind: input, shape index: {}]   ;;  %s426_s1 = inlined_call_operand.vmem [shape: f32[5,128], index: 1, kind: input, shape index: {}]   ;;  %s427_s2 = inlined_call_operand.vmem [shape: f32[1,128], index: 2, kind: input, shape index: {}]   ;;  %s428_s4 = inlined_call_operand.vmem [shape: f32[1,8], index: 4, kind: input, shape index: {}]   ;;  %s429_s5 = inlined_call_operand.vmem [shape: f32[16,8], index: 5, kind: output, shape index: {}]  }
   0x1   :  { %313 = vset.pattern.permute.xlu1 %v320_v0  ;;  %311 = vset.pattern.permute.xlu0 %v320_v0  ;;  %v21_v1 = vld [vmem:[%s424_s0 + $0x8] sm:$0xff]  ;;  %v20_v2 = vld [vmem:[%s424_s0] sm:$0xff]  ;;  %v116_v5 = vld [vmem:[%s425_s3 + $0x10] sm:$0xff]  ;;  %v324_v18 = vmov 4   ;;  %v33_v31 = vlaneseq  ;;  %vm212_vm0 = vcmask 64512  }
   0x2   :  { %30 = vperm.xlu1 %313, %v21_v1   ;;  %25 = vperm.xlu0 %311, %v20_v2   ;;  %v114_v3 = vld [vmem:[%s425_s3] sm:$0xff]  ;;  %v115_v4 = vld [vmem:[%s425_s3 + $0x8] sm:$0xff]  ;;  %v117_v7 = vld [vmem:[%s425_s3 + $0x18] sm:$0xff] }
   0x3   :  { %v274_v6 = vpack.c.bf16 %v115_v4, %v114_v3  ;;  %v278_v8 = vpack.c.bf16 %v117_v7, %v116_v5  ;;  %v118_v10 = vld [vmem:[%s425_s3 + $0x20] sm:$0xff]  ;;  %v119_v11 = vld [vmem:[%s425_s3 + $0x28] sm:$0xff]  ;;  %v120_v14 = vld [vmem:[%s425_s3 + $0x30] sm:$0xff]  ;;  %v34_v32 = vshrl.u32 %v33_v31, 7 }
   0x4   :  { %v282_v12 = vpack.c.bf16 %v119_v11, %v118_v10  ;;  %v121_v15 = vld [vmem:[%s425_s3 + $0x38] sm:$0xff]  ;;  %v122_v19 = vld [vmem:[%s425_s3 + $0x40] sm:$0xff]  ;;  %v123_v20 = vld [vmem:[%s425_s3 + $0x48] sm:$0xff] }
   0x5   :  { %275 = vmatprep.subr.bf16.mxu0 %v274_v6  ;;  %v286_v16 = vpack.c.bf16 %v121_v15, %v120_v14  ;;  %v290_v21 = vpack.c.bf16 %v123_v20, %v122_v19  ;;  %v124_v22 = vld [vmem:[%s425_s3 + $0x50] sm:$0xff]  ;;  %v125_v23 = vld [vmem:[%s425_s3 + $0x58] sm:$0xff]  ;;  %v126_v25 = vld [vmem:[%s425_s3 + $0x60] sm:$0xff]  ;;  %v35_v35 = vsub.s32 0, %v34_v32  ;;  %v49_v36 = vsub.s32 1, %v34_v32 }
   0x6   :  { %314 = vset.pattern.permute.xlu1 %v321_v9  ;;  %312 = vset.pattern.permute.xlu0 %v321_v9  ;;  %v294_v24 = vpack.c.bf16 %v125_v23, %v124_v22  ;;  %v127_v26 = vld [vmem:[%s425_s3 + $0x68] sm:$0xff]  ;;  %v128_v28 = vld [vmem:[%s425_s3 + $0x70] sm:$0xff]  ;;  %v129_v29 = vld [vmem:[%s425_s3 + $0x78] sm:$0xff]  ;;  %v65_v38 = vsub.s32 2, %v34_v32  ;;  %v81_v46 = vsub.s32 3, %v34_v32  ;;  %v97_v47 = vsub.s32 4, %v34_v32 }
   0x7   :  { %44 = vperm.xlu1 %314, %v21_v1   ;;  %40 = vperm.xlu0 %312, %v20_v2   ;;  %v298_v27 = vpack.c.bf16 %v127_v26, %v126_v25  ;;  %v302_v30 = vpack.c.bf16 %v129_v29, %v128_v28  ;;  %v22_v37 = vld [vmem:[%s426_s1] sm:$0x1f] }
   0x8   :  { %277 = vmatpush3.bf16.msra.mxu0 %v274_v6  ;;  %v36_v41 = vrot.slane %v22_v37, %v35_v35  ;;  %v50_v42 = vrot.slane %v22_v37, %v49_v36  ;;  %v66_v43 = vrot.slane %v22_v37, %v65_v38  ;;  %v82_v52 = vrot.slane %v22_v37, %v81_v46  ;;  %v219_v0 = vld [vmem:[%s427_s2] ss:$0 sm:$0xff] }
   0x9   :  { %279 = vmatprep.subr.bf16.mxu0 %v278_v8  ;;  %v98_v53 = vrot.slane %v22_v37, %v97_v47 }
   0xb   :  { %315 = vset.pattern.permute.xlu1 %v322_v13  ;;  %316 = vset.pattern.permute.xlu0 %v322_v13  ;;  %v220_v13 = vld [vmem:[%s428_s4] ss:$0 sm:$0xff] }
   0xc   :  { %56 = vperm.xlu1 %315, %v20_v2   ;;  %60 = vperm.xlu0 %316, %v21_v1  }
   0xd   :  { %281 = vmatpush3.bf16.msra.mxu0 %v278_v8 }
   0xe   :  { %283 = vmatprep.subr.bf16.mxu0 %v282_v12 }
  0x10   :  { %317 = vset.pattern.permute.xlu1 %v323_v17  ;;  %318 = vset.pattern.permute.xlu0 %v324_v18 }
  0x11   :  { %72 = vperm.xlu1 %317, %v20_v2   ;;  %88 = vperm.xlu0 %318, %v20_v2  }
  0x12   :  { %285 = vmatpush3.bf16.msra.mxu0 %v282_v12 }
  0x13   :  { %287 = vmatprep.subr.bf16.mxu0 %v286_v16 }
  0x15   :  { %76 = vperm.xlu1 %317, %v21_v1  }
  0x16   :  { %289 = vmatpush3.bf16.msra.mxu0 %v286_v16 }
  0x17   :  { %291 = vmatprep.subr.bf16.mxu0 %v290_v21 }
  0x19   :  { %319 = vset.pattern.permute.xlu1 %v324_v18 }
  0x1a   :  { %92 = vperm.xlu1 %319, %v21_v1   ;;  %293 = vmatpush3.bf16.msra.mxu0 %v290_v21 }
  0x1b   :  { %295 = vmatprep.subr.bf16.mxu0 %v294_v24 }
  0x1e   :  { %297 = vmatpush3.bf16.msra.mxu0 %v294_v24 }
  0x1f   :  { %299 = vmatprep.subr.bf16.mxu0 %v298_v27 }
  0x22   :  { %301 = vmatpush3.bf16.msra.mxu0 %v298_v27 }
  0x23   :  { %303 = vmatprep.subr.bf16.mxu0 %v302_v30 }
  0x26   :  { %305 = vmatpush3.bf16.msra.mxu0 %v302_v30 }
  0x81   :  { %v31_v33 = vpop.permute.xlu1 %30  ;;  %v26_v34 = vpop.permute.xlu0 %25 }
  0x82   :  { %v37_v44 = vmul.f32 %v36_v41, %v26_v34  ;;  %v38_v61 = vmul.f32 %v36_v41, %v31_v33 }
  0x86   :  { %v45_v39 = vpop.permute.xlu1 %44  ;;  %v41_v40 = vpop.permute.xlu0 %40 }
  0x87   :  { %v51_v45 = vmul.f32 %v50_v42, %v41_v40  ;;  %v52_v59 = vmul.f32 %v50_v42, %v45_v39 }
  0x89   :  { %v53_v50 = vadd.f32 %v51_v45, %v37_v44  ;;  %v54_v2 = vadd.f32 %v52_v59, %v38_v61 }
  0x8b   :  { %v57_v48 = vpop.permute.xlu1 %56  ;;  %v61_v49 = vpop.permute.xlu0 %60 }
  0x8c   :  { %v67_v51 = vmul.f32 %v66_v43, %v57_v48  ;;  %v68_v62 = vmul.f32 %v66_v43, %v61_v49 }
  0x8e   :  { %v69_v56 = vadd.f32 %v67_v51, %v53_v50  ;;  %v70_v5 = vadd.f32 %v68_v62, %v54_v2 }
  0x90   :  { %v73_v54 = vpop.permute.xlu1 %72  ;;  %v89_v55 = vpop.permute.xlu0 %88 }
  0x91   :  { %v83_v57 = vmul.f32 %v82_v52, %v73_v54  ;;  %v99_v58 = vmul.f32 %v98_v53, %v89_v55 }
  0x93   :  { %v85_v60 = vadd.f32 %v83_v57, %v69_v56 }
  0x94   :  { %v77_v63 = vpop.permute.xlu1 %76 }
  0x95   :  { %v101_v1 = vadd.f32 %v99_v58, %v85_v60  ;;  %v84_v3 = vmul.f32 %v82_v52, %v77_v63 }
  0x97   :  { %v110_v4 = vadd.f32 %v219_v0, %v101_v1  ;;  %v86_v8 = vadd.f32 %v84_v3, %v70_v5 }
  0x99   :  { %v93_v6 = vpop.permute.xlu1 %92  ;;  %v112_v7 = vmax.f32 %v110_v4, 0.0 }
  0x9a   :  { %v100_v9 = vmul.f32 %v98_v53, %v93_v6 }
  0x9b   :  { %271 = vmatprep.mubr.f32.mxu0 %v112_v7 }
  0x9c   :  { %v102_v10 = vadd.f32 %v100_v9, %v86_v8 }
  0x9e   :  { %v111_v11 = vadd.f32 %v219_v0, %v102_v10 }
  0xa0   :  { %v113_v12 = vmax.f32 %v111_v11, 0.0 }
  0xa2   :  { %272 = vmatmul.mubr.f32.vlgmr.msra.gmra.mrb[0].mxu0 %v113_v12 }
 0x175   :  { %v273_v14 = vpop.f32.mrb[0].mxu0 }
 0x176   :  { %v209_v15 = vadd.f32 %v273_v14, %v220_v13  ;;  %v203_v16 = vpop.f32.mrb[1].mxu0 }
 0x177   :  { %v204_v17 = vadd.f32 %v220_v13, %v203_v16 }
 0x178   :  { %214 = vst.msk [vmem:[%s429_s5 + $0x8] sm:$0xff] %vm212_vm0, %v209_v15 }
 0x179   :  { %213 = vst.msk [vmem:[%s429_s5] sm:$0xff] %vm212_vm0, %v204_v17 }

</bundles_post_ra>
